<compile_context>
chip_gen: v7x
topology: tpu7x:2x2x1
jax: 0.10.0
libtpu: 0.0.40
codegen_flags: <defaults>
</compile_context>

<pallas_src>
import functools

import jax
import jax.numpy as jnp
from jax.experimental import pallas as pl
from jax.experimental.pallas import tpu as pltpu

LANE = 128       # TPU lane width
SUB = 16         # sublane multiple (bf16-native tile height; also fine for f32)
N_LAYERS = 4


def _round_up(n, m):
    return ((n + m - 1) // m) * m


def _layout(input_size, hidden_size, output_size):
    """Pick lane width and per-sample slot width for block-diagonal packing."""
    max_dim = max(input_size, hidden_size, output_size)
    lanes = max(LANE, _round_up(max_dim, LANE))
    if lanes == LANE and max_dim <= 32:
        slot = 32          # 4 samples per 128-lane row
    elif lanes == LANE and max_dim <= 64:
        slot = 64          # 2 samples per row
    else:
        slot = lanes       # 1 sample per row (plain zero-padding)
    return lanes, slot


def _qnet_kernel(x_ref, w_ref, b_ref, out_ref):
    """Fused 4-layer MLP on one row tile.

    x_ref  : (TB, lanes)        bf16 packed activations
    w_ref  : (4, lanes, lanes)  bf16 block-diagonal weights, layout (in, out)
    b_ref  : (4, 1, lanes)      f32 packed biases
    out_ref: (TB, lanes)        f32 lane-dense packed output
    """
    h = jnp.dot(x_ref[...], w_ref[0], preferred_element_type=jnp.float32)
    h = jnp.maximum(h + b_ref[0], 0.0)
    h = jnp.dot(h.astype(jnp.bfloat16), w_ref[1], preferred_element_type=jnp.float32)
    h = jnp.maximum(h + b_ref[1], 0.0)
    h = jnp.dot(h.astype(jnp.bfloat16), w_ref[2], preferred_element_type=jnp.float32)
    h = jnp.maximum(h + b_ref[2], 0.0)
    out_ref[...] = jnp.dot(h.astype(jnp.bfloat16), w_ref[3],
                           preferred_element_type=jnp.float32) + b_ref[3]


@functools.partial(jax.jit,
                   static_argnames=("in_size", "out_size", "slot", "lanes"))
def qnet_forward(x, w_packed, b_packed, *, in_size, out_size, slot, lanes):
    """x: (B, in_size). Returns (B, out_size) f32."""
    B = x.shape[0]
    spr = lanes // slot                          # samples packed per lane row
    rows = -(-B // spr)                          # ceil(B / spr)
    rows_pad = _round_up(max(rows, 1), SUB)

    # Pack: sample i -> row i // spr, lane slot i % spr.  Only slot/feature
    # padding is materialized; no batch round-up to the tile size.
    x_packed = (jnp.zeros((rows_pad * spr, slot), jnp.bfloat16)
                .at[:B, :in_size].set(x.astype(jnp.bfloat16))
                .reshape(rows_pad, lanes))

    # Row tile: multiple of SUB sublanes, capped at 512 rows, chosen so large
    # batches produce >= 2 grid steps (v7x dual-TC sharding of the parallel axis).
    tb = min(512, _round_up(max(-(-rows_pad // 2), SUB), SUB))
    tb = min(tb, rows_pad)
    grid = (pl.cdiv(rows_pad, tb),)              # non-divisible last tile is masked

    flops = 2 * rows_pad * lanes * lanes * N_LAYERS
    bytes_accessed = (x_packed.size * 2 + w_packed.size * 2
                      + b_packed.size * 4 + rows_pad * lanes * 4)

    out = pl.pallas_call(
        _qnet_kernel,
        out_shape=jax.ShapeDtypeStruct((rows_pad, lanes), jnp.float32),
        grid=grid,
        in_specs=[
            # batch-row tile streams through the pipeline
            pl.BlockSpec((tb, lanes), lambda i: (i, 0)),
            # packed weights / biases stay VMEM-resident (constant index_map)
            pl.BlockSpec((N_LAYERS, lanes, lanes), lambda i: (0, 0, 0)),
            pl.BlockSpec((N_LAYERS, 1, lanes), lambda i: (0, 0, 0)),
        ],
        out_specs=pl.BlockSpec((tb, lanes), lambda i: (i, 0)),
        compiler_params=pltpu.CompilerParams(
            dimension_semantics=("parallel",)),
        cost_estimate=pl.CostEstimate(
            flops=flops, transcendentals=0, bytes_accessed=bytes_accessed),
    )(x_packed, w_packed, b_packed)

    # De-interleave: row r, slot s -> sample r*spr + s; slice real output cols.
    return out.reshape(rows_pad * spr, slot)[:B, :out_size]


def init_params(key, input_size, hidden_size, output_size):
    """PyTorch nn.Linear default init: U(-1/sqrt(fan_in), +1/sqrt(fan_in)).
    Returns a list of (W, b) with W stored transposed as (in, out)."""
    dims = [(input_size, hidden_size), (hidden_size, hidden_size),
            (hidden_size, hidden_size), (hidden_size, output_size)]
    keys = jax.random.split(key, len(dims))
    raw = []
    for k, (fi, fo) in zip(keys, dims):
        kw, kb = jax.random.split(k)
        bound = 1.0 / (float(fi) ** 0.5)
        w = jax.random.uniform(kw, (fi, fo), jnp.float32, -bound, bound)
        b = jax.random.uniform(kb, (fo,), jnp.float32, -bound, bound)
        raw.append((w, b))
    return raw


def pack_params(raw, *, slot, lanes):
    """Pack all layers into two slabs (3 kernel operands total):
    bf16 block-diagonal weights (in, out) and f32 biases, one copy per slot."""
    spr = lanes // slot
    w_packed = jnp.zeros((N_LAYERS, lanes, lanes), jnp.bfloat16)
    b_packed = jnp.zeros((N_LAYERS, 1, lanes), jnp.float32)
    for l, (w, b) in enumerate(raw):
        fi, fo = w.shape
        wb = w.astype(jnp.bfloat16)
        bf = b.astype(jnp.float32)
        for s in range(spr):
            w_packed = w_packed.at[l, s * slot:s * slot + fi,
                                   s * slot:s * slot + fo].set(wb)
            b_packed = b_packed.at[l, 0, s * slot:s * slot + fo].set(bf)
    return w_packed, b_packed


def reference_forward(x, raw):
    h = x
    for l, (w, b) in enumerate(raw):
        h = h @ w + b
        if l < len(raw) - 1:
            h = jnp.maximum(h, 0.0)
    return h


# TODO(synk): Linear_QNet.save() (torch.save of the state dict) is file I/O,
# not a forward-pass op, and has no Pallas equivalent.

if __name__ == "__main__":
    input_size, hidden_size, output_size = 11, 32, 3   # typical snake Q-net sizes
    batch = 6                                          # small demo batch (not a multiple of 4)

    key = jax.random.PRNGKey(0)
    kx, kp = jax.random.split(key)
    x = jax.random.normal(kx, (batch, input_size), jnp.float32)

    raw_params = init_params(kp, input_size, hidden_size, output_size)
    lanes, slot = _layout(input_size, hidden_size, output_size)
    w_packed, b_packed = pack_params(raw_params, slot=slot, lanes=lanes)

    out = qnet_forward(x, w_packed, b_packed,
                       in_size=input_size, out_size=output_size,
                       slot=slot, lanes=lanes)
    out = jax.block_until_ready(out)

    ref = reference_forward(x, raw_params)
    assert out.shape == (batch, output_size), out.shape
    # bf16 MXU operands with f32 accumulation -> compare loosely vs f32 reference.
    assert jnp.allclose(out, ref, atol=5e-2, rtol=5e-2), "mismatch vs reference"

    print("KERNEL_OK")
</pallas_src>

<mosaic_0001>
module attributes {stable_mosaic.version = 11 : i64} {
  func.func @_qnet_kernel(%arg0: i32, %arg1: memref<16x128xbf16, #tpu.memory_space<vmem>>, %arg2: memref<4x128x128xbf16, #tpu.memory_space<vmem>>, %arg3: memref<4x1x128xf32, #tpu.memory_space<vmem>>, %arg4: memref<16x128xf32, #tpu.memory_space<vmem>>) attributes {dimension_semantics = [#tpu.dimension_semantics<parallel>], iteration_bounds = array<i64: 1>, scalar_prefetch = 0 : i64, scratch_operands = 0 : i64, tpu.core_type = #tpu.core_type<tc>, window_params = [{transform_indices = @transform_0, window_bounds = array<i64: 16, 128>}, {pipeline_mode = #tpu.pipeline_mode<synchronous>, transform_indices = @transform_1, window_bounds = array<i64: 4, 128, 128>}, {pipeline_mode = #tpu.pipeline_mode<synchronous>, transform_indices = @transform_2, window_bounds = array<i64: 4, 1, 128>}, {transform_indices = @transform_3, window_bounds = array<i64: 16, 128>}]} {
    %c0 = arith.constant 0 : index
    %c0_0 = arith.constant 0 : index
    %0 = vector.load %arg1[%c0, %c0_0] : memref<16x128xbf16, #tpu.memory_space<vmem>>, vector<16x128xbf16>
    %c0_1 = arith.constant 0 : index
    %c0_2 = arith.constant 0 : index
    %c0_3 = arith.constant 0 : index
    %1 = vector.load %arg2[%c0_1, %c0_2, %c0_3] : memref<4x128x128xbf16, #tpu.memory_space<vmem>>, vector<1x128x128xbf16>
    %2 = vector.shape_cast %1 : vector<1x128x128xbf16> to vector<128x128xbf16>
    %cst = arith.constant dense<0.000000e+00> : vector<16x128xf32>
    %3 = tpu.matmul %0, %2, %cst {dimension_numbers = #tpu.dot_dimension_numbers<[1], [0], [0], [1], [0, 0, 1, 1], [], []>} : vector<16x128xbf16>, vector<128x128xbf16>, vector<16x128xf32> -> vector<16x128xf32>
    %c0_4 = arith.constant 0 : index
    %c0_5 = arith.constant 0 : index
    %c0_6 = arith.constant 0 : index
    %4 = vector.load %arg3[%c0_4, %c0_5, %c0_6] : memref<4x1x128xf32, #tpu.memory_space<vmem>>, vector<1x1x128xf32>
    %5 = vector.shape_cast %4 : vector<1x1x128xf32> to vector<1x128xf32>
    %6 = vector.broadcast %5 : vector<1x128xf32> to vector<16x128xf32>
    %7 = arith.addf %3, %6 : vector<16x128xf32>
    %cst_7 = arith.constant 0.000000e+00 : f32
    %8 = vector.broadcast %cst_7 : f32 to vector<16x128xf32>
    %9 = arith.maximumf %7, %8 : vector<16x128xf32>
    %10 = arith.truncf %9 : vector<16x128xf32> to vector<16x128xbf16>
    %c1 = arith.constant 1 : index
    %c0_8 = arith.constant 0 : index
    %c0_9 = arith.constant 0 : index
    %11 = vector.load %arg2[%c1, %c0_8, %c0_9] : memref<4x128x128xbf16, #tpu.memory_space<vmem>>, vector<1x128x128xbf16>
    %12 = vector.shape_cast %11 : vector<1x128x128xbf16> to vector<128x128xbf16>
    %cst_10 = arith.constant dense<0.000000e+00> : vector<16x128xf32>
    %13 = tpu.matmul %10, %12, %cst_10 {dimension_numbers = #tpu.dot_dimension_numbers<[1], [0], [0], [1], [0, 0, 1, 1], [], []>} : vector<16x128xbf16>, vector<128x128xbf16>, vector<16x128xf32> -> vector<16x128xf32>
    %c1_11 = arith.constant 1 : index
    %c0_12 = arith.constant 0 : index
    %c0_13 = arith.constant 0 : index
    %14 = vector.load %arg3[%c1_11, %c0_12, %c0_13] : memref<4x1x128xf32, #tpu.memory_space<vmem>>, vector<1x1x128xf32>
    %15 = vector.shape_cast %14 : vector<1x1x128xf32> to vector<1x128xf32>
    %16 = vector.broadcast %15 : vector<1x128xf32> to vector<16x128xf32>
    %17 = arith.addf %13, %16 : vector<16x128xf32>
    %cst_14 = arith.constant 0.000000e+00 : f32
    %18 = vector.broadcast %cst_14 : f32 to vector<16x128xf32>
    %19 = arith.maximumf %17, %18 : vector<16x128xf32>
    %20 = arith.truncf %19 : vector<16x128xf32> to vector<16x128xbf16>
    %c2 = arith.constant 2 : index
    %c0_15 = arith.constant 0 : index
    %c0_16 = arith.constant 0 : index
    %21 = vector.load %arg2[%c2, %c0_15, %c0_16] : memref<4x128x128xbf16, #tpu.memory_space<vmem>>, vector<1x128x128xbf16>
    %22 = vector.shape_cast %21 : vector<1x128x128xbf16> to vector<128x128xbf16>
    %cst_17 = arith.constant dense<0.000000e+00> : vector<16x128xf32>
    %23 = tpu.matmul %20, %22, %cst_17 {dimension_numbers = #tpu.dot_dimension_numbers<[1], [0], [0], [1], [0, 0, 1, 1], [], []>} : vector<16x128xbf16>, vector<128x128xbf16>, vector<16x128xf32> -> vector<16x128xf32>
    %c2_18 = arith.constant 2 : index
    %c0_19 = arith.constant 0 : index
    %c0_20 = arith.constant 0 : index
    %24 = vector.load %arg3[%c2_18, %c0_19, %c0_20] : memref<4x1x128xf32, #tpu.memory_space<vmem>>, vector<1x1x128xf32>
    %25 = vector.shape_cast %24 : vector<1x1x128xf32> to vector<1x128xf32>
    %26 = vector.broadcast %25 : vector<1x128xf32> to vector<16x128xf32>
    %27 = arith.addf %23, %26 : vector<16x128xf32>
    %cst_21 = arith.constant 0.000000e+00 : f32
    %28 = vector.broadcast %cst_21 : f32 to vector<16x128xf32>
    %29 = arith.maximumf %27, %28 : vector<16x128xf32>
    %30 = arith.truncf %29 : vector<16x128xf32> to vector<16x128xbf16>
    %c3 = arith.constant 3 : index
    %c0_22 = arith.constant 0 : index
    %c0_23 = arith.constant 0 : index
    %31 = vector.load %arg2[%c3, %c0_22, %c0_23] : memref<4x128x128xbf16, #tpu.memory_space<vmem>>, vector<1x128x128xbf16>
    %32 = vector.shape_cast %31 : vector<1x128x128xbf16> to vector<128x128xbf16>
    %cst_24 = arith.constant dense<0.000000e+00> : vector<16x128xf32>
    %33 = tpu.matmul %30, %32, %cst_24 {dimension_numbers = #tpu.dot_dimension_numbers<[1], [0], [0], [1], [0, 0, 1, 1], [], []>} : vector<16x128xbf16>, vector<128x128xbf16>, vector<16x128xf32> -> vector<16x128xf32>
    %c3_25 = arith.constant 3 : index
    %c0_26 = arith.constant 0 : index
    %c0_27 = arith.constant 0 : index
    %34 = vector.load %arg3[%c3_25, %c0_26, %c0_27] : memref<4x1x128xf32, #tpu.memory_space<vmem>>, vector<1x1x128xf32>
    %35 = vector.shape_cast %34 : vector<1x1x128xf32> to vector<1x128xf32>
    %36 = vector.broadcast %35 : vector<1x128xf32> to vector<16x128xf32>
    %37 = arith.addf %33, %36 : vector<16x128xf32>
    %c0_28 = arith.constant 0 : index
    %c0_29 = arith.constant 0 : index
    %38 = vector.load %arg4[%c0_28, %c0_29] : memref<16x128xf32, #tpu.memory_space<vmem>>, vector<16x128xf32>
    tpu.vector_store %arg4[%c0_28, %c0_29], %37 {strides = array<i32>} : memref<16x128xf32, #tpu.memory_space<vmem>>, vector<16x128xf32>,
    return
  }
  func.func @transform_0(%arg0: i32) -> (i32, i32) {
    %c0_i32 = arith.constant 0 : i32
    %c0_i32_0 = arith.constant 0 : i32
    return %arg0, %c0_i32 : i32, i32
  }
  func.func @transform_1(%arg0: i32) -> (i32, i32, i32) {
    %c0_i32 = arith.constant 0 : i32
    %c0_i32_0 = arith.constant 0 : i32
    %c0_i32_1 = arith.constant 0 : i32
    %c0_i32_2 = arith.constant 0 : i32
    return %c0_i32, %c0_i32_0, %c0_i32_1 : i32, i32, i32
  }
  func.func @transform_2(%arg0: i32) -> (i32, i32, i32) {
    %c0_i32 = arith.constant 0 : i32
    %c0_i32_0 = arith.constant 0 : i32
    %c0_i32_1 = arith.constant 0 : i32
    %c0_i32_2 = arith.constant 0 : i32
    return %c0_i32, %c0_i32_0, %c0_i32_1 : i32, i32, i32
  }
  func.func @transform_3(%arg0: i32) -> (i32, i32) {
    %c0_i32 = arith.constant 0 : i32
    %c0_i32_0 = arith.constant 0 : i32
    return %arg0, %c0_i32 : i32, i32
  }
}

</mosaic_0001>

<bundles_post_ra>
// kernel: qnet_forward.1
= control target key start
LH: loop header
LB: loop body
LE: loop exit
PB: predicated region body
PF: predicated region fallthrough
CT: control target
= control target key end

     0   :  { %8 = vsyncpa [#allocation3], 0  ;;  %s725_s12 = smov [#allocation2]   ;;  %s823_s0 = inlined_call_operand.vmem [shape: bf16[16,128], index: 0, kind: input, shape index: {}]   ;;  %s824_s1 = inlined_call_operand.hbm [shape: bf16[4,128,128], index: 1, kind: input, shape index: {}]   ;;  %s825_s2 = inlined_call_operand.vmem [shape: f32[4,1,128], index: 2, kind: input, shape index: {}]   ;;  %s826_s3 = inlined_call_operand.vmem [shape: f32[16,128], index: 3, kind: output, shape index: {}]  }
   0x1   :  { %s16_s13 = sshll.u32 %s725_s12, 4  ;;  %s701_s16 = scalar_lea.hbm %s824_s1, 4096  ;;  %s17_s13 = int_to_ptr.vmem [resolvable:$true] %s16_s13 }
   0x2   :  { %p702_p0 = scmp.ne.s32.totalorder %s824_s1, %s701_s16  ;;  %p705_p1 = scmp.lt.u32.totalorder %s701_s16, %s824_s1 }
   0x4   :  { %p707_p2 = pnand %p705_p1, %p702_p0 }
   0x6   :  { %710 = shalt.err (!%p707_p2)
}
   0x7   :  { %s711_s21 = scalar_lea.vmem %s17_s13, 4096  ;;  %p716_p4 = scmp.lt.s32.totalorder %s17_s13, %s17_s13 }
   0x8   :  { %p712_p3 = scmp.ne.s32.totalorder %s17_s13, %s711_s21  ;;  %p717_p5 = scmp.lt.s32.totalorder %s711_s21, %s711_s21 }
   0xa   :  { %p718_p6 = por %p717_p5, %p716_p4 }
   0xc   :  { %p719_p7 = pnand %p718_p6, %p712_p3 }
   0xe   :  { %722 = shalt.err (!%p719_p7)
}
   0xf   :  { %s726_s22 = smov 64   ;;  %s727_s23 = smov 4  }
  0x10   :  { %22 = dma.hbm_to_vmem [thread:$0]  %s824_s1, 4096, %s17_s13, [#allocation3], %s726_s22, %s726_s22, %s727_s23  }
  0x11   :  { %723 = dma.done.wait [#allocation3], 4096  }
  0x12   :  { %724 = vsyncadd [#allocation3], 4294963200  ;;  %v728_v0 = vmov 0.0   ;;  %vm729_vm0 = vmmov 0   ;;  %v668_v1 = vld [vmem:[#allocation2] sm:$0xff]   ;;  %v669_v2 = vld [vmem:[#allocation2 + $0x8] sm:$0xff]  }
  0x13   :  { %583 = vmatprep.subr.bf16.mxu0 %v728_v0  ;;  %599 = vmatprep.mubr.msk.bf16.mxu0 %vm729_vm0, %v728_v0  ;;  %v670_v3 = vld [vmem:[#allocation2 + $0x10] sm:$0xff]   ;;  %v677_v4 = vld [vmem:[#allocation2 + $0x40] sm:$0xff]   ;;  %v671_v5 = vld [vmem:[#allocation2 + $0x18] sm:$0xff]  }
  0x14   :  { %603 = vmatprep.subr.bf16.mxu1 %v728_v0  ;;  %619 = vmatprep.mubr.msk.bf16.mxu1 %vm729_vm0, %v728_v0  ;;  %v678_v6 = vld [vmem:[#allocation2 + $0x48] sm:$0xff]   ;;  %v672_v7 = vld [vmem:[#allocation2 + $0x20] sm:$0xff]   ;;  %v679_v8 = vld [vmem:[#allocation2 + $0x50] sm:$0xff]  }
  0x15   :  { %584 = vmatpush3.bf16.msra.mxu0 %v668_v1  ;;  %604 = vmatpush3.bf16.msra.mxu1 %v677_v4  ;;  %v673_v9 = vld [vmem:[#allocation2 + $0x28] sm:$0xff]   ;;  %v680_v10 = vld [vmem:[#allocation2 + $0x58] sm:$0xff]   ;;  %v674_v11 = vld [vmem:[#allocation2 + $0x30] sm:$0xff]  }
  0x16   :  { %585 = vmatprep.subr.bf16.mxu0 %v728_v0  ;;  %605 = vmatprep.subr.bf16.mxu1 %v728_v0  ;;  %v681_v12 = vld [vmem:[#allocation2 + $0x60] sm:$0xff]   ;;  %v675_v13 = vld [vmem:[#allocation2 + $0x38] sm:$0xff]   ;;  %v682_v14 = vld [vmem:[#allocation2 + $0x68] sm:$0xff]  }
  0x17   :  { %v676_v15 = vld [vmem:[%s823_s0] sm:$0xff]   ;;  %v683_v16 = vld [vmem:[#allocation2 + $0x70] sm:$0xff]   ;;  %v684_v17 = vld [vmem:[#allocation2 + $0x78] sm:$0xff]  }
  0x18   :  { %v685_v18 = vld [vmem:[#allocation2 + $0x80] sm:$0xff]   ;;  %v686_v19 = vld [vmem:[#allocation2 + $0x88] sm:$0xff]   ;;  %v687_v20 = vld [vmem:[#allocation2 + $0x90] sm:$0xff]  }
  0x19   :  { %586 = vmatpush3.bf16.msra.mxu0 %v669_v2  ;;  %606 = vmatpush3.bf16.msra.mxu1 %v678_v6  ;;  %v688_v21 = vld [vmem:[#allocation2 + $0x98] sm:$0xff]   ;;  %v689_v22 = vld [vmem:[#allocation2 + $0xa0] sm:$0xff]   ;;  %v690_v23 = vld [vmem:[#allocation2 + $0xa8] sm:$0xff]  }
  0x1a   :  { %587 = vmatprep.subr.bf16.mxu0 %v728_v0  ;;  %607 = vmatprep.subr.bf16.mxu1 %v728_v0  ;;  %v507_v24 = vld [vmem:[%s825_s2] ss:$0 sm:$0xff]  ;;  %v691_v34 = vld [vmem:[#allocation2 + $0xb0] sm:$0xff]   ;;  %v692_v35 = vld [vmem:[#allocation2 + $0xb8] sm:$0xff]  }
  0x1b   :  { %v693_v36 = vld [vmem:[#allocation2 + $0xc0] sm:$0xff]   ;;  %v694_v37 = vld [vmem:[#allocation2 + $0xc8] sm:$0xff]   ;;  %v695_v38 = vld [vmem:[#allocation2 + $0xd0] sm:$0xff]  }
  0x1c   :  { %v696_v39 = vld [vmem:[#allocation2 + $0xd8] sm:$0xff]   ;;  %v697_v40 = vld [vmem:[#allocation2 + $0xe0] sm:$0xff]   ;;  %v698_v41 = vld [vmem:[#allocation2 + $0xe8] sm:$0xff]  }
  0x1d   :  { %588 = vmatpush3.bf16.msra.mxu0 %v670_v3  ;;  %608 = vmatpush3.bf16.msra.mxu1 %v679_v8  ;;  %v518_v42 = vld [vmem:[%s825_s2 + $0x1] ss:$0 sm:$0xff]  ;;  %v699_v52 = vld [vmem:[#allocation2 + $0xf0] sm:$0xff]   ;;  %v700_v53 = vld [vmem:[#allocation2 + $0xf8] sm:$0xff]  }
  0x1e   :  { %589 = vmatprep.subr.bf16.mxu0 %v728_v0  ;;  %609 = vmatprep.subr.bf16.mxu1 %v728_v0  ;;  %v528_v54 = vld [vmem:[%s825_s2 + $0x2] ss:$0 sm:$0xff] }
  0x21   :  { %590 = vmatpush3.bf16.msra.mxu0 %v671_v5  ;;  %610 = vmatpush3.bf16.msra.mxu1 %v680_v10 }
  0x22   :  { %591 = vmatprep.subr.bf16.mxu0 %v728_v0  ;;  %611 = vmatprep.subr.bf16.mxu1 %v728_v0 }
  0x25   :  { %592 = vmatpush3.bf16.msra.mxu0 %v672_v7  ;;  %612 = vmatpush3.bf16.msra.mxu1 %v681_v12 }
  0x26   :  { %593 = vmatprep.subr.bf16.mxu0 %v728_v0  ;;  %613 = vmatprep.subr.bf16.mxu1 %v728_v0 }
  0x29   :  { %594 = vmatpush3.bf16.msra.mxu0 %v673_v9  ;;  %614 = vmatpush3.bf16.msra.mxu1 %v682_v14 }
  0x2a   :  { %595 = vmatprep.subr.bf16.mxu0 %v728_v0  ;;  %615 = vmatprep.subr.bf16.mxu1 %v728_v0 }
  0x2d   :  { %596 = vmatpush3.bf16.msra.mxu0 %v674_v11  ;;  %616 = vmatpush3.bf16.msra.mxu1 %v683_v16 }
  0x2e   :  { %597 = vmatprep.subr.bf16.mxu0 %v728_v0  ;;  %617 = vmatprep.subr.bf16.mxu1 %v728_v0 }
  0x31   :  { %598 = vmatpush3.bf16.msra.mxu0 %v675_v13  ;;  %618 = vmatpush3.bf16.msra.mxu1 %v684_v17 }
  0x32   :  { %623 = vmatprep.subr.bf16.mxu0 %v728_v0  ;;  %643 = vmatprep.subr.bf16.mxu1 %v728_v0 }
  0x34   :  { %600 = vmatmul.mubr.bf16.vlgmr.msra.gmra.mrb[0].mxu0 %v676_v15 }
  0x35   :  { %639 = vmatprep.mubr.msk.bf16.mxu0 %vm729_vm0, %v728_v0  ;;  %624 = vmatpush3.bf16.msra.mxu0 %v685_v18 }
  0x36   :  { %625 = vmatprep.subr.bf16.mxu0 %v728_v0 }
  0x39   :  { %626 = vmatpush3.bf16.msra.mxu0 %v686_v19 }
  0x3a   :  { %627 = vmatprep.subr.bf16.mxu0 %v728_v0 }
  0x3d   :  { %628 = vmatpush3.bf16.msra.mxu0 %v687_v20 }
  0x3e   :  { %629 = vmatprep.subr.bf16.mxu0 %v728_v0 }
  0x41   :  { %630 = vmatpush3.bf16.msra.mxu0 %v688_v21 }
  0x42   :  { %631 = vmatprep.subr.bf16.mxu0 %v728_v0 }
  0x45   :  { %632 = vmatpush3.bf16.msra.mxu0 %v689_v22 }
  0x46   :  { %633 = vmatprep.subr.bf16.mxu0 %v728_v0 }
  0x49   :  { %634 = vmatpush3.bf16.msra.mxu0 %v690_v23 }
  0x4a   :  { %635 = vmatprep.subr.bf16.mxu0 %v728_v0 }
  0x4d   :  { %636 = vmatpush3.bf16.msra.mxu0 %v691_v34 }
  0x4e   :  { %637 = vmatprep.subr.bf16.mxu0 %v728_v0 }
  0x51   :  { %638 = vmatpush3.bf16.msra.mxu0 %v692_v35 }
 0x107   :  { %v142_v25 = vpop.f32.mrb[0].mxu0 }
 0x108   :  { %v143_v26 = vadd.f32 %v507_v24, %v142_v25  ;;  %v601_v27 = vpop.f32.mrb[1].mxu0 }
 0x109   :  { %v145_v28 = vpop.f32.mrb[2].mxu0 }
 0x10a   :  { %v146_v29 = vadd.f32 %v507_v24, %v145_v28  ;;  %v602_v30 = vpop.f32.mrb[3].mxu0  ;;  %v149_v31 = vmax.f32 %v143_v26, 0.0 }
 0x10c   :  { %v150_v32 = vmax.f32 %v146_v29, 0.0 }
 0x10e   :  { %v151_v33 = vpack.c.bf16 %v150_v32, %v149_v31 }
 0x110   :  { %620 = vmatmul.mubr.bf16.vlgmr.msra.gmra.mrb[0].mxu1 %v151_v33 }
 0x111   :  { %659 = vmatprep.mubr.msk.bf16.mxu1 %vm729_vm0, %v728_v0  ;;  %644 = vmatpush3.bf16.msra.mxu1 %v693_v36 }
 0x112   :  { %645 = vmatprep.subr.bf16.mxu1 %v728_v0 }
 0x115   :  { %646 = vmatpush3.bf16.msra.mxu1 %v694_v37 }
 0x116   :  { %647 = vmatprep.subr.bf16.mxu1 %v728_v0 }
 0x119   :  { %648 = vmatpush3.bf16.msra.mxu1 %v695_v38 }
 0x11a   :  { %649 = vmatprep.subr.bf16.mxu1 %v728_v0 }
 0x11d   :  { %650 = vmatpush3.bf16.msra.mxu1 %v696_v39 }
 0x11e   :  { %651 = vmatprep.subr.bf16.mxu1 %v728_v0 }
 0x121   :  { %652 = vmatpush3.bf16.msra.mxu1 %v697_v40 }
 0x122   :  { %653 = vmatprep.subr.bf16.mxu1 %v728_v0 }
 0x125   :  { %654 = vmatpush3.bf16.msra.mxu1 %v698_v41 }
 0x126   :  { %655 = vmatprep.subr.bf16.mxu1 %v728_v0 }
 0x129   :  { %656 = vmatpush3.bf16.msra.mxu1 %v699_v52 }
 0x12a   :  { %657 = vmatprep.subr.bf16.mxu1 %v728_v0  ;;  %v538_v0 = vld [vmem:[%s825_s2 + $0x3] ss:$0 sm:$0xff] }
 0x12d   :  { %658 = vmatpush3.bf16.msra.mxu1 %v700_v53 }
 0x1e3   :  { %v259_v43 = vpop.f32.mrb[0].mxu1 }
 0x1e4   :  { %v260_v44 = vadd.f32 %v518_v42, %v259_v43  ;;  %v621_v45 = vpop.f32.mrb[1].mxu1 }
 0x1e5   :  { %v262_v46 = vpop.f32.mrb[2].mxu1 }
 0x1e6   :  { %v263_v47 = vadd.f32 %v518_v42, %v262_v46  ;;  %v622_v48 = vpop.f32.mrb[3].mxu1  ;;  %v266_v49 = vmax.f32 %v260_v44, 0.0 }
 0x1e8   :  { %v267_v50 = vmax.f32 %v263_v47, 0.0 }
 0x1ea   :  { %v268_v51 = vpack.c.bf16 %v267_v50, %v266_v49 }
 0x1ec   :  { %640 = vmatmul.mubr.bf16.vlgmr.msra.gmra.mrb[4].mxu0 %v268_v51 }
 0x2bf   :  { %v376_v55 = vpop.f32.mrb[4].mxu0 }
 0x2c0   :  { %v377_v56 = vadd.f32 %v528_v54, %v376_v55  ;;  %v641_v57 = vpop.f32.mrb[5].mxu0 }
 0x2c1   :  { %v379_v58 = vpop.f32.mrb[6].mxu0 }
 0x2c2   :  { %v380_v59 = vadd.f32 %v528_v54, %v379_v58  ;;  %v642_v60 = vpop.f32.mrb[7].mxu0  ;;  %v383_v61 = vmax.f32 %v377_v56, 0.0 }
 0x2c4   :  { %v384_v62 = vmax.f32 %v380_v59, 0.0 }
 0x2c6   :  { %v385_v63 = vpack.c.bf16 %v384_v62, %v383_v61 }
 0x2c8   :  { %660 = vmatmul.mubr.bf16.vlgmr.msra.gmra.mrb[4].mxu1 %v385_v63 }
 0x39b   :  { %v493_v1 = vpop.f32.mrb[4].mxu1 }
 0x39c   :  { %v494_v2 = vadd.f32 %v538_v0, %v493_v1  ;;  %v661_v3 = vpop.f32.mrb[5].mxu1 }
 0x39d   :  { %v496_v4 = vpop.f32.mrb[6].mxu1 }
 0x39e   :  { %500 = vst [vmem:[%s826_s3] sm:$0xff] %v494_v2  ;;  %v497_v5 = vadd.f32 %v538_v0, %v496_v4  ;;  %v662_v6 = vpop.f32.mrb[7].mxu1 }
 0x3a0   :  { %501 = vst [vmem:[%s826_s3 + $0x8] sm:$0xff] %v497_v5 }
 0x3a1   :  { %506 = vsyncpa [#allocation3], 1 }

</bundles_post_ra>
